<compile_context>
chip_gen: v6e
topology: v6e:2x2x1
jax: 0.10.0
libtpu: 0.0.40
codegen_flags: <defaults>
</compile_context>

<pallas_src>
import jax
import jax.numpy as jnp
from jax.experimental import pallas as pl
from jax.experimental.pallas import tpu as pltpu


# ---------------------------------------------------------------------------
# small helpers
# ---------------------------------------------------------------------------
def _apply_act(y, act):
    if act == "relu":
        return jnp.maximum(y, 0.0)
    if act == "sigmoid":
        return jax.nn.sigmoid(y)
    return y


# module-level index maps (stable identities -> no re-lowering across calls)
def _x_imap(g):
    return (g, 0)


def _w_imap(g):
    return (0, 0)


def _o_imap(g):
    return (g, 0)


# ---------------------------------------------------------------------------
# Host-side precompute: fold one ConvTranspose2d into (N_cat[, A_cat], bias)
# ---------------------------------------------------------------------------
def _prep_layer(w, b, H, W, *, kernel, stride, padding, out_padding, act,
                compute_dtype, is_last):
    """y_stw = bias + sum_kh A_kh @ (x_stw @ N_kh)   with x_stw laid out (H, Cin*W).

    All k taps of N are concatenated along the lane axis (slabs padded to a
    multiple of 128) so the kernel issues ONE x @ N_cat matmul per layer.
    """
    Cin, Cout, k, _ = w.shape
    s, p, op = stride, padding, out_padding
    assert k == kernel
    Hout = (H - 1) * s - 2 * p + k + op
    Wout = (W - 1) * s - 2 * p + k + op
    p_lo = k - 1 - p
    CW = Cout * Wout
    slab = ((CW + 127) // 128) * 128          # lane-aligned tap slab width

    # spatially flipped weight: wf[ci, co, kh, kw] = w[ci, co, k-1-kh, k-1-kw]
    wf = jnp.flip(w, axis=(2, 3))

    # B[kw, iw, ow] = 1 iff kw + ow == p_lo + s*iw   (column scatter, folded in N)
    kw = jnp.arange(k)[:, None, None]
    iw = jnp.arange(W)[None, :, None]
    ow = jnp.arange(Wout)[None, None, :]
    B = (kw + ow == p_lo + s * iw).astype(jnp.float32)            # (k, W, Wout)

    # N[kh, ci*W+iw, co*Wout+ow] = sum_kw wf[ci,co,kh,kw] * B[kw,iw,ow]
    Nm = jnp.einsum("iors,swv->riwov", wf, B,
                    precision=jax.lax.Precision.HIGHEST).reshape(k, Cin * W, CW)
    Nm = jnp.pad(Nm, ((0, 0), (0, 0), (0, slab - CW)))            # pad slabs to 128
    N_cat = jnp.transpose(Nm, (1, 0, 2)).reshape(Cin * W, k * slab)
    N_cat = N_cat.astype(compute_dtype)                           # bf16 MXU operand

    b_row = jnp.repeat(b, Wout).reshape(1, CW).astype(jnp.float32)

    # Last layer with the module's default config can scatter entirely off-MXU
    # and emit a lane-paired output (even|odd rows side by side in lanes).
    specialized = bool(is_last and k == 3 and s == 2 and p == 1 and op == 1)
    if specialized:
        arrs = (N_cat, jnp.concatenate([b_row, b_row], axis=1))   # (1, 2*CW)
    else:
        # A[kh, oh, ih] = 1 iff kh + oh == p_lo + s*ih  (row scatter + interleave)
        kh = jnp.arange(k)[:, None, None]
        oh = jnp.arange(Hout)[None, :, None]
        ih = jnp.arange(H)[None, None, :]
        A = (kh + oh == p_lo + s * ih).astype(jnp.float32)        # (k, Hout, H)
        A_cat = jnp.transpose(A, (1, 0, 2)).reshape(Hout, k * H)  # exact 0/1, f32
        arrs = (N_cat, A_cat, b_row)

    meta = dict(H=H, W=W, Cin=Cin, Cout=Cout, Hout=Hout, Wout=Wout,
                CW=CW, slab=slab, k=k, act=act, specialized=specialized)
    return arrs, meta


# ---------------------------------------------------------------------------
# Fused Pallas kernel: all decoder layers, Bblk batch elements per grid step
# ---------------------------------------------------------------------------
def _make_kernel(metas, Bblk):
    n_layers = len(metas)

    def kernel(x_ref, *refs):
        o_ref = refs[-1]
        wrefs = refs[:-1]
        x = x_ref[...]                                   # (Bblk*H0, Cin0*W0)
        wi = 0
        for li in range(n_layers):
            m = metas[li]
            H, CW, slab, k, act = m["H"], m["CW"], m["slab"], m["k"], m["act"]
            n_ref = wrefs[wi]; wi += 1
            # ONE MXU push per layer: all k taps live in N_cat's lane axis.
            T = jnp.dot(x.astype(n_ref.dtype), n_ref[...],
                        preferred_element_type=jnp.float32)   # (Bblk*H, k*slab) f32

            if m["specialized"]:
                # stride-2/k=3/p=1/op=1 head: scatter on VPU only (no MXU).
                b_ref = wrefs[wi]; wi += 1                     # (1, 2*CW)
                t0 = T[:, 0:CW]
                t1 = T[:, slab:slab + CW]
                t2 = T[:, 2 * slab:2 * slab + CW]
                rows = Bblk * H
                # odd output row 2j+1 needs tap2 of input row j+1 -> shift up 1 row
                t2s = jnp.concatenate(
                    [t2[1:, :], jnp.zeros((1, CW), jnp.float32)], axis=0)
                if Bblk > 1:   # don't let the shift cross batch-element boundaries
                    ridx = jax.lax.broadcasted_iota(jnp.int32, (rows, CW), 0)
                    t2s = jnp.where((ridx % H) == (H - 1), 0.0, t2s)
                even = t1                       # logical output rows 2j
                odd = t0 + t2s                  # logical output rows 2j+1
                y = jnp.concatenate([even, odd], axis=1) + b_ref[...]
                y = _apply_act(y, act)          # (Bblk*H, 2*CW): 128-lane-dense
                o_ref[...] = y.astype(o_ref.dtype)
            else:
                a_ref = wrefs[wi]; wi += 1                     # (Hout, k*H) 0/1 f32
                b_ref = wrefs[wi]; wi += 1                     # (1, CW)
                outs = []
                for bb in range(Bblk):          # tiny per-element scatter matmul
                    Tb = T[bb * H:(bb + 1) * H, :]
                    T_vert = jnp.concatenate(
                        [Tb[:, t * slab:t * slab + CW] for t in range(k)], axis=0)
                    yb = b_ref[...] + jnp.dot(a_ref[...], T_vert,
                                              preferred_element_type=jnp.float32)
                    outs.append(yb)
                y = outs[0] if Bblk == 1 else jnp.concatenate(outs, axis=0)
                y = _apply_act(y, act)          # (Bblk*Hout, CW), natural row order
                if li == n_layers - 1:
                    o_ref[...] = y.astype(o_ref.dtype)
                else:
                    x = y                       # feeds next layer in-VMEM

    return kernel


# ---------------------------------------------------------------------------
# Build + jit the forward callable for a fixed (batch, input-shape)
# ---------------------------------------------------------------------------
def _build_forward(layer_arrs, metas, Nb, C0, H0, W0, Bblk, compute_dtype):
    G = Nb // Bblk
    CinW0 = C0 * W0
    last = metas[-1]
    Cout, Hl, Wl, CWl = last["Cout"], last["Hout"], last["Wout"], last["CW"]

    if last["specialized"]:
        out_rows = last["H"]            # = Hl // 2 rows per element, lane-paired
        out_cols = 2 * CWl              # 128-lane-dense stores
    else:
        out_rows = Hl
        out_cols = CWl

    in_specs = [pl.BlockSpec((Bblk * H0, CinW0), _x_imap)]
    weights = []
    for arrs in layer_arrs:
        for a in arrs:
            in_specs.append(pl.BlockSpec(a.shape, _w_imap))
            weights.append(a)

    call = pl.pallas_call(
        _make_kernel(metas, Bblk),
        out_shape=jax.ShapeDtypeStruct((Nb * out_rows, out_cols), jnp.float32),
        grid_spec=pltpu.PrefetchScalarGridSpec(
            num_scalar_prefetch=0,
            grid=(G,),
            in_specs=in_specs,
            out_specs=pl.BlockSpec((Bblk * out_rows, out_cols), _o_imap),
        ),
        # TODO(synk): for much larger spatial inputs, single-buffer the constant
        # weight blocks and set vmem_limit_bytes explicitly -- N_cat grows as
        # O(k*Cin*W*Cout*Wout) and v7x only has 64 MiB of VMEM (<1 MiB here).
        compiler_params=pltpu.CompilerParams(dimension_semantics=("parallel",)),
    )

    def forward(x_nchw):
        # NCHW -> rows (n, h) x lanes (cin, w); cast to bf16 at the boundary.
        xr = jnp.transpose(x_nchw, (0, 2, 1, 3)).reshape(Nb * H0, CinW0)
        out = call(xr.astype(compute_dtype), *weights)
        if last["specialized"]:
            # (Nb*Hl/2, 2*CW) lane-paired -> (Nb, Cout, Hl, Wl)
            y = out.reshape(Nb, Hl // 2, 2, Cout, Wl)
            y = jnp.transpose(y, (0, 3, 1, 2, 4)).reshape(Nb, Cout, Hl, Wl)
        else:
            y = out.reshape(Nb, Hl, Cout, Wl).transpose(0, 2, 1, 3)
        return y

    return jax.jit(forward)


# ---------------------------------------------------------------------------
# Decoder module (mirrors the PyTorch Decoder of Decoder_blocks)
# ---------------------------------------------------------------------------
class DecoderPallas:
    def __init__(self, num_layers, channels, kernels, strides, activations, key,
                 compute_dtype=jnp.bfloat16):
        assert len(channels) - 1 == len(kernels)
        assert len(strides) == len(kernels) and num_layers == len(strides)
        assert num_layers == len(activations)
        self.compute_dtype = compute_dtype
        self.params = []      # raw (weight, bias) in PyTorch ConvTranspose2d layout
        self.cfg = []
        for i in range(num_layers):
            cin, cout, k = channels[i], channels[i + 1], kernels[i]
            key, kw_, kb_ = jax.random.split(key, 3)
            fan_in = cin * k * k
            w = jax.random.normal(kw_, (cin, cout, k, k), jnp.float32) / jnp.sqrt(fan_in)
            b = jax.random.normal(kb_, (cout,), jnp.float32) * 0.01
            self.params.append((w, b))
            self.cfg.append(dict(kernel=k, stride=strides[i], padding=1,
                                 out_padding=1, act=activations[i]))
        # cache is keyed on _version: bump it (invalidate_cache) if params change,
        # otherwise stale folded weight matrices would be served.
        self._version = 0
        self._cache = {}

    def invalidate_cache(self):
        self._version += 1
        self._cache.clear()

    @staticmethod
    def _pick_bblk(Nb):
        # Several elements per grid step, but keep grid length >= 2 so v7x's
        # second TensorCore still gets a share of the batch.
        for cand in (4, 3, 2):
            if Nb % cand == 0 and Nb // cand >= 2:
                return cand
        return 1

    def _forward_for(self, Nb, C, H, W):
        key = (self._version, Nb, C, H, W)
        if key not in self._cache:
            layer_arrs, metas = [], []
            h, w_ = H, W
            n_layers = len(self.params)
            for idx, ((wt, b), cfg) in enumerate(zip(self.params, self.cfg)):
                arrs, m = _prep_layer(wt, b, h, w_, is_last=(idx == n_layers - 1),
                                      compute_dtype=self.compute_dtype, **cfg)
                layer_arrs.append(arrs)
                metas.append(m)
                h, w_ = m["Hout"], m["Wout"]
            self._cache[key] = _build_forward(layer_arrs, metas, Nb, C, H, W,
                                              self._pick_bblk(Nb), self.compute_dtype)
        return self._cache[key]

    def __call__(self, x_nchw):
        Nb, C, H, W = x_nchw.shape
        return self._forward_for(Nb, C, H, W)(x_nchw)


# ---------------------------------------------------------------------------
# Pure-JAX reference (dilate + pad + flipped-kernel conv == conv_transpose)
# ---------------------------------------------------------------------------
def _ref_block(x_nhwc, weight, bias, *, kernel, stride, padding, out_padding, act):
    p_lo = kernel - 1 - padding
    p_hi = kernel - 1 - padding + out_padding
    w_f = jnp.flip(weight, axis=(2, 3)).transpose(2, 3, 0, 1)   # HWIO
    y = jax.lax.conv_general_dilated(
        x_nhwc, w_f, window_strides=(1, 1),
        padding=[(p_lo, p_hi), (p_lo, p_hi)],
        lhs_dilation=(stride, stride),
        dimension_numbers=("NHWC", "HWIO", "NHWC"),
        precision=jax.lax.Precision.HIGHEST,
    ) + bias.reshape(1, 1, 1, -1)
    return _apply_act(y, act)


def _ref_forward(dec, x_nchw):
    xr = jnp.transpose(x_nchw, (0, 2, 3, 1))
    for (w, b), cfg in zip(dec.params, dec.cfg):
        xr = _ref_block(xr, w, b, **cfg)
    return jnp.transpose(xr, (0, 3, 1, 2))


if __name__ == "__main__":
    key = jax.random.PRNGKey(0)

    # Decoder config: 3 upsample-by-2 blocks, final sigmoid (depth head).
    num_layers = 3
    channels = [8, 8, 4, 1]
    kernels = [3, 3, 3]
    strides = [2, 2, 2]
    activations = ["relu", "relu", "sigmoid"]

    key, kx, kp = jax.random.split(key, 3)
    x2 = jax.random.normal(kx, (2, 8, 8, 8), jnp.float32)   # NCHW

    # 1) all-f32 compute path at tight tolerance (so scatter/layout regressions
    #    can't hide behind the bf16 tolerance).
    dec_f32 = DecoderPallas(num_layers, channels, kernels, strides, activations, kp,
                            compute_dtype=jnp.float32)
    out_f32 = jax.block_until_ready(dec_f32(x2))
    assert out_f32.shape == (2, 1, 64, 64), out_f32.shape
    ref2 = _ref_forward(dec_f32, x2)
    err_f32 = float(jnp.max(jnp.abs(out_f32 - ref2)))
    assert err_f32 < 1e-3, err_f32

    # 2) bf16 MXU-operand path (the performance default), batch=2 -> grid of 2.
    dec = DecoderPallas(num_layers, channels, kernels, strides, activations, kp,
                        compute_dtype=jnp.bfloat16)
    out_bf = jax.block_until_ready(dec(x2))
    assert out_bf.shape == (2, 1, 64, 64), out_bf.shape
    err_bf = float(jnp.max(jnp.abs(out_bf - ref2)))
    assert err_bf < 2.5e-2, err_bf

    # 3) exercise batch blocking (Bblk=2, grid still 2 steps) on a batch of 4.
    x4 = jax.random.normal(kx, (4, 8, 8, 8), jnp.float32)
    out4 = jax.block_until_ready(dec(x4))
    assert out4.shape == (4, 1, 64, 64), out4.shape
    ref4 = _ref_forward(dec, x4)
    err4 = float(jnp.max(jnp.abs(out4 - ref4)))
    assert err4 < 2.5e-2, err4

    print("KERNEL_OK")
</pallas_src>

<mosaic_0001>
module attributes {stable_mosaic.version = 11 : i64} {
  func.func @kernel(%arg0: i32, %arg1: memref<8x64xf32, #tpu.memory_space<vmem>>, %arg2: memref<64x384xf32, #tpu.memory_space<vmem>>, %arg3: memref<16x24xf32, #tpu.memory_space<vmem>>, %arg4: memref<1x128xf32, #tpu.memory_space<vmem>>, %arg5: memref<128x384xf32, #tpu.memory_space<vmem>>, %arg6: memref<32x48xf32, #tpu.memory_space<vmem>>, %arg7: memref<1x128xf32, #tpu.memory_space<vmem>>, %arg8: memref<128x384xf32, #tpu.memory_space<vmem>>, %arg9: memref<1x128xf32, #tpu.memory_space<vmem>>, %arg10: memref<32x128xf32, #tpu.memory_space<vmem>>) attributes {dimension_semantics = [#tpu.dimension_semantics<parallel>], iteration_bounds = array<i64: 2>, scalar_prefetch = 0 : i64, scratch_operands = 0 : i64, tpu.core_type = #tpu.core_type<tc>, window_params = [{transform_indices = @transform_0, window_bounds = array<i64: 8, 64>}, {pipeline_mode = #tpu.pipeline_mode<synchronous>, transform_indices = @transform_1, window_bounds = array<i64: 64, 384>}, {pipeline_mode = #tpu.pipeline_mode<synchronous>, transform_indices = @transform_2, window_bounds = array<i64: 16, 24>}, {pipeline_mode = #tpu.pipeline_mode<synchronous>, transform_indices = @transform_3, window_bounds = array<i64: 1, 128>}, {pipeline_mode = #tpu.pipeline_mode<synchronous>, transform_indices = @transform_4, window_bounds = array<i64: 128, 384>}, {pipeline_mode = #tpu.pipeline_mode<synchronous>, transform_indices = @transform_5, window_bounds = array<i64: 32, 48>}, {pipeline_mode = #tpu.pipeline_mode<synchronous>, transform_indices = @transform_6, window_bounds = array<i64: 1, 128>}, {pipeline_mode = #tpu.pipeline_mode<synchronous>, transform_indices = @transform_7, window_bounds = array<i64: 128, 384>}, {pipeline_mode = #tpu.pipeline_mode<synchronous>, transform_indices = @transform_8, window_bounds = array<i64: 1, 128>}, {transform_indices = @transform_9, window_bounds = array<i64: 32, 128>}]} {
    %c0 = arith.constant 0 : index
    %c0_0 = arith.constant 0 : index
    %0 = vector.load %arg1[%c0, %c0_0] : memref<8x64xf32, #tpu.memory_space<vmem>>, vector<8x64xf32>
    %c0_1 = arith.constant 0 : index
    %c0_2 = arith.constant 0 : index
    %1 = vector.load %arg2[%c0_1, %c0_2] : memref<64x384xf32, #tpu.memory_space<vmem>>, vector<64x384xf32>
    %cst = arith.constant dense<0.000000e+00> : vector<8x384xf32>
    %2 = tpu.matmul %0, %1, %cst {dimension_numbers = #tpu.dot_dimension_numbers<[1], [0], [0], [1], [0, 0, 1, 1], [], []>} : vector<8x64xf32>, vector<64x384xf32>, vector<8x384xf32> -> vector<8x384xf32>
    %3 = vector.extract_strided_slice %2 {offsets = [0, 0], sizes = [8, 128], strides = [1, 1]} : vector<8x384xf32> to vector<8x128xf32>
    %4 = vector.extract_strided_slice %2 {offsets = [0, 128], sizes = [8, 128], strides = [1, 1]} : vector<8x384xf32> to vector<8x128xf32>
    %5 = vector.extract_strided_slice %2 {offsets = [0, 256], sizes = [8, 128], strides = [1, 1]} : vector<8x384xf32> to vector<8x128xf32>
    %6 = tpu.concatenate %3, %4, %5 in 0 : vector<8x128xf32>, vector<8x128xf32>, vector<8x128xf32> -> vector<24x128xf32>
    %c0_3 = arith.constant 0 : index
    %c0_4 = arith.constant 0 : index
    %7 = vector.load %arg4[%c0_3, %c0_4] : memref<1x128xf32, #tpu.memory_space<vmem>>, vector<1x128xf32>
    %c0_5 = arith.constant 0 : index
    %c0_6 = arith.constant 0 : index
    %8 = vector.load %arg3[%c0_5, %c0_6] : memref<16x24xf32, #tpu.memory_space<vmem>>, vector<16x24xf32>
    %cst_7 = arith.constant dense<0.000000e+00> : vector<16x128xf32>
    %9 = tpu.matmul %8, %6, %cst_7 {dimension_numbers = #tpu.dot_dimension_numbers<[1], [0], [0], [1], [0, 0, 1, 1], [], []>} : vector<16x24xf32>, vector<24x128xf32>, vector<16x128xf32> -> vector<16x128xf32>
    %10 = vector.broadcast %7 : vector<1x128xf32> to vector<16x128xf32>
    %11 = arith.addf %10, %9 : vector<16x128xf32>
    %cst_8 = arith.constant 0.000000e+00 : f32
    %12 = vector.broadcast %cst_8 : f32 to vector<16x128xf32>
    %13 = arith.maximumf %11, %12 : vector<16x128xf32>
    %c0_9 = arith.constant 0 : index
    %c0_10 = arith.constant 0 : index
    %14 = vector.load %arg5[%c0_9, %c0_10] : memref<128x384xf32, #tpu.memory_space<vmem>>, vector<128x384xf32>
    %cst_11 = arith.constant dense<0.000000e+00> : vector<16x384xf32>
    %15 = tpu.matmul %13, %14, %cst_11 {dimension_numbers = #tpu.dot_dimension_numbers<[1], [0], [0], [1], [0, 0, 1, 1], [], []>} : vector<16x128xf32>, vector<128x384xf32>, vector<16x384xf32> -> vector<16x384xf32>
    %16 = vector.extract_strided_slice %15 {offsets = [0, 0], sizes = [16, 128], strides = [1, 1]} : vector<16x384xf32> to vector<16x128xf32>
    %17 = vector.extract_strided_slice %15 {offsets = [0, 128], sizes = [16, 128], strides = [1, 1]} : vector<16x384xf32> to vector<16x128xf32>
    %18 = vector.extract_strided_slice %15 {offsets = [0, 256], sizes = [16, 128], strides = [1, 1]} : vector<16x384xf32> to vector<16x128xf32>
    %19 = tpu.concatenate %16, %17, %18 in 0 : vector<16x128xf32>, vector<16x128xf32>, vector<16x128xf32> -> vector<48x128xf32>
    %c0_12 = arith.constant 0 : index
    %c0_13 = arith.constant 0 : index
    %20 = vector.load %arg7[%c0_12, %c0_13] : memref<1x128xf32, #tpu.memory_space<vmem>>, vector<1x128xf32>
    %c0_14 = arith.constant 0 : index
    %c0_15 = arith.constant 0 : index
    %21 = vector.load %arg6[%c0_14, %c0_15] : memref<32x48xf32, #tpu.memory_space<vmem>>, vector<32x48xf32>
    %cst_16 = arith.constant dense<0.000000e+00> : vector<32x128xf32>
    %22 = tpu.matmul %21, %19, %cst_16 {dimension_numbers = #tpu.dot_dimension_numbers<[1], [0], [0], [1], [0, 0, 1, 1], [], []>} : vector<32x48xf32>, vector<48x128xf32>, vector<32x128xf32> -> vector<32x128xf32>
    %23 = vector.broadcast %20 : vector<1x128xf32> to vector<32x128xf32>
    %24 = arith.addf %23, %22 : vector<32x128xf32>
    %cst_17 = arith.constant 0.000000e+00 : f32
    %25 = vector.broadcast %cst_17 : f32 to vector<32x128xf32>
    %26 = arith.maximumf %24, %25 : vector<32x128xf32>
    %c0_18 = arith.constant 0 : index
    %c0_19 = arith.constant 0 : index
    %27 = vector.load %arg8[%c0_18, %c0_19] : memref<128x384xf32, #tpu.memory_space<vmem>>, vector<128x384xf32>
    %cst_20 = arith.constant dense<0.000000e+00> : vector<32x384xf32>
    %28 = tpu.matmul %26, %27, %cst_20 {dimension_numbers = #tpu.dot_dimension_numbers<[1], [0], [0], [1], [0, 0, 1, 1], [], []>} : vector<32x128xf32>, vector<128x384xf32>, vector<32x384xf32> -> vector<32x384xf32>
    %29 = vector.extract_strided_slice %28 {offsets = [0, 0], sizes = [32, 64], strides = [1, 1]} : vector<32x384xf32> to vector<32x64xf32>
    %30 = vector.extract_strided_slice %28 {offsets = [0, 128], sizes = [32, 64], strides = [1, 1]} : vector<32x384xf32> to vector<32x64xf32>
    %31 = vector.extract_strided_slice %28 {offsets = [0, 256], sizes = [32, 64], strides = [1, 1]} : vector<32x384xf32> to vector<32x64xf32>
    %32 = vector.extract_strided_slice %31 {offsets = [1, 0], sizes = [31, 64], strides = [1, 1]} : vector<32x64xf32> to vector<31x64xf32>
    %cst_21 = arith.constant 0.000000e+00 : f32
    %33 = vector.broadcast %cst_21 : f32 to vector<1x64xf32>
    %34 = tpu.concatenate %32, %33 in 0 : vector<31x64xf32>, vector<1x64xf32> -> vector<32x64xf32>
    %35 = arith.addf %29, %34 : vector<32x64xf32>
    %36 = tpu.concatenate %30, %35 in 1 : vector<32x64xf32>, vector<32x64xf32> -> vector<32x128xf32>
    %c0_22 = arith.constant 0 : index
    %c0_23 = arith.constant 0 : index
    %37 = vector.load %arg9[%c0_22, %c0_23] : memref<1x128xf32, #tpu.memory_space<vmem>>, vector<1x128xf32>
    %38 = vector.broadcast %37 : vector<1x128xf32> to vector<32x128xf32>
    %39 = arith.addf %36, %38 : vector<32x128xf32>
    %40 = arith.negf %39 : vector<32x128xf32>
    %41 = math.exp %40 : vector<32x128xf32>
    %cst_24 = arith.constant 1.000000e+00 : f32
    %42 = vector.broadcast %cst_24 : f32 to vector<32x128xf32>
    %43 = arith.addf %42, %41 : vector<32x128xf32>
    %44 = arith.divf %42, %43 : vector<32x128xf32>
    %c0_25 = arith.constant 0 : index
    %c0_26 = arith.constant 0 : index
    %45 = vector.load %arg10[%c0_25, %c0_26] : memref<32x128xf32, #tpu.memory_space<vmem>>, vector<32x128xf32>
    tpu.vector_store %arg10[%c0_25, %c0_26], %44 {strides = array<i32>} : memref<32x128xf32, #tpu.memory_space<vmem>>, vector<32x128xf32>,
    return
  }
  func.func @transform_0(%arg0: i32) -> (i32, i32) {
    %c0_i32 = arith.constant 0 : i32
    %c0_i32_0 = arith.constant 0 : i32
    return %arg0, %c0_i32 : i32, i32
  }
  func.func @transform_1(%arg0: i32) -> (i32, i32) {
    %c0_i32 = arith.constant 0 : i32
    %c0_i32_0 = arith.constant 0 : i32
    %c0_i32_1 = arith.constant 0 : i32
    return %c0_i32, %c0_i32_0 : i32, i32
  }
  func.func @transform_2(%arg0: i32) -> (i32, i32) {
    %c0_i32 = arith.constant 0 : i32
    %c0_i32_0 = arith.constant 0 : i32
    %c0_i32_1 = arith.constant 0 : i32
    return %c0_i32, %c0_i32_0 : i32, i32
  }
  func.func @transform_3(%arg0: i32) -> (i32, i32) {
    %c0_i32 = arith.constant 0 : i32
    %c0_i32_0 = arith.constant 0 : i32
    %c0_i32_1 = arith.constant 0 : i32
    return %c0_i32, %c0_i32_0 : i32, i32
  }
  func.func @transform_4(%arg0: i32) -> (i32, i32) {
    %c0_i32 = arith.constant 0 : i32
    %c0_i32_0 = arith.constant 0 : i32
    %c0_i32_1 = arith.constant 0 : i32
    return %c0_i32, %c0_i32_0 : i32, i32
  }
  func.func @transform_5(%arg0: i32) -> (i32, i32) {
    %c0_i32 = arith.constant 0 : i32
    %c0_i32_0 = arith.constant 0 : i32
    %c0_i32_1 = arith.constant 0 : i32
    return %c0_i32, %c0_i32_0 : i32, i32
  }
  func.func @transform_6(%arg0: i32) -> (i32, i32) {
    %c0_i32 = arith.constant 0 : i32
    %c0_i32_0 = arith.constant 0 : i32
    %c0_i32_1 = arith.constant 0 : i32
    return %c0_i32, %c0_i32_0 : i32, i32
  }
  func.func @transform_7(%arg0: i32) -> (i32, i32) {
    %c0_i32 = arith.constant 0 : i32
    %c0_i32_0 = arith.constant 0 : i32
    %c0_i32_1 = arith.constant 0 : i32
    return %c0_i32, %c0_i32_0 : i32, i32
  }
  func.func @transform_8(%arg0: i32) -> (i32, i32) {
    %c0_i32 = arith.constant 0 : i32
    %c0_i32_0 = arith.constant 0 : i32
    %c0_i32_1 = arith.constant 0 : i32
    return %c0_i32, %c0_i32_0 : i32, i32
  }
  func.func @transform_9(%arg0: i32) -> (i32, i32) {
    %c0_i32 = arith.constant 0 : i32
    %c0_i32_0 = arith.constant 0 : i32
    return %arg0, %c0_i32 : i32, i32
  }
}

</mosaic_0001>

<bundles_post_ra>
// kernel: forward.1
= control target key start
LH: loop header
LB: loop body
LE: loop exit
PB: predicated region body
PF: predicated region fallthrough
CT: control target
= control target key end

     0   :  { %14 = vsyncpa [#allocation3], 0  ;;  %s2054_s0 = inlined_call_operand.vmem [shape: f32[16,64], index: 0, kind: input, shape index: {}]   ;;  %s2055_s1 = inlined_call_operand.hbm [shape: f32[64,384], index: 1, kind: input, shape index: {}]   ;;  %s2056_s2 = inlined_call_operand.hbm [shape: f32[16,24], index: 2, kind: input, shape index: {}]   ;;  %s2057_s3 = inlined_call_operand.vmem [shape: f32[1,128], index: 3, kind: input, shape index: {}]   ;;  %s2058_s4 = inlined_call_operand.hbm [shape: f32[128,384], index: 4, kind: input, shape index: {}]   ;;  %s2059_s5 = inlined_call_operand.vmem [shape: f32[32,48], index: 5, kind: input, shape index: {}]   ;;  %s2060_s6 = inlined_call_operand.vmem [shape: f32[1,128], index: 6, kind: input, shape index: {}]   ;;  %s2061_s7 = inlined_call_operand.vmem [shape: f32[128,384], index: 7, kind: input, shape index: {}]   ;;  %s2062_s8 = inlined_call_operand.vmem [shape: f32[1,128], index: 8, kind: input, shape index: {}]   ;;  %s2063_s9 = inlined_call_operand.vmem [shape: f32[64,128], index: 9, kind: output, shape index: {}]  }
   0x1   :  { %15 = vsyncpa [#allocation5], 0  ;;  %s1774_s30 = smov 0  }
   0x2 LB: > { %s1714_s10 = smov [#allocation4]   ;;  %s1780_s12 = sadd.s32 4294967295, %s1712_s30   ;;  %s1712_s30 = sphi %s1774_s30, %s21_s30  }
   0x3   : > { %s271_s11 = sshll.u32 %s1714_s10, 4  ;;  %p1348_p0 = scmp.ge.s32.totalorder %s1712_s30, 1  ;;  %s272_s11 = int_to_ptr.vmem [resolvable:$true] %s271_s11 }
   0x4   : > { %p246_p1 = scmp.lt.s32.totalorder %s1712_s30, 3  ;;  %p1580_p2 = scmp.eq.s32.totalorder %s1780_s12, 0 }
   0x5   : > { %s1715_s14 = smov [#allocation2]   ;;  %s1716_s17 = smov [#allocation6]  }
   0x6   : > { %p1785_p3 = pnand %p1348_p0, %p246_p1  ;;  %s258_s15 = sshll.u32 %s1715_s14, 4  ;;  %s1791_s15 = int_to_ptr.vmem [resolvable:$true] %s258_s15 }
   0x7   : > { %s1799_s18 = sshll.u32 %s1716_s17, 4  ;;  %s1631_s19 = scalar_lea.vmem %s272_s11, 256  ;;  %s288_s18 = int_to_ptr.vmem [resolvable:$true] %s1799_s18 }
   0x8   : > { %p1570_p4 = pneg %p1785_p3  ;;  %p1632_p7 = scmp.ne.s32.totalorder %s272_s11, %s1631_s19 }
   0x9   : > { %p1639_p10 = scmp.lt.s32.totalorder %s272_s11, %s272_s11  ;;  %p1640_p11 = scmp.lt.s32.totalorder %s1631_s19, %s1631_s19 }
   0xa   : > { %p1795_p5 = pnand %p1580_p2, %p1570_p4 }
   0xb   : > { %p1641_p12 = por %p1640_p11, %p1639_p10 }
   0xc   : > { %p1622_p6 = pneg %p1795_p5 }
   0xe   : > { %p1634_p8 = pnand %p1632_p7, %p1622_p6 }
  0x10   : > { %p1635_p9 = pneg %p1634_p8 }
  0x12   : > { %p1642_p13 = pnand %p1641_p12, %p1635_p9 }
  0x14   : > { %1645 = shalt.err (!%p1642_p13)
}
  0x15   : > { %s1717_s20 = smov 128   ;;  %s1718_s21 = smov 8  }
  0x16   : > { %1576 = dma.hbm_to_vmem [thread:$0]  (!%p1795_p5), %s2056_s2, 256, %s272_s11, [#allocation5], %s1717_s20, %s1717_s20, %s1718_s21  }
  0x17   : > { %s1657_s24 = scalar_lea.vmem %s1791_s15, 3072  ;;  %p1665_p7 = scmp.lt.s32.totalorder %s1791_s15, %s1791_s15 }
  0x18   : > { %p1658_p0 = scmp.ne.s32.totalorder %s1791_s15, %s1657_s24  ;;  %p1666_p8 = scmp.lt.s32.totalorder %s1657_s24, %s1657_s24 }
  0x1a   : > { %p1660_p1 = pnand %p1658_p0, %p1622_p6  ;;  %p1667_p9 = por %p1666_p8, %p1665_p7 }
  0x1c   : > { %p1661_p4 = pneg %p1660_p1 }
  0x1e   : > { %p1668_p10 = pnand %p1667_p9, %p1661_p4 }
  0x20   : > { %1671 = shalt.err (!%p1668_p10)
}
  0x21   : > { %s1719_s25 = smov 384   ;;  %s1720_s26 = smov 24  }
  0x22   : > { %1573 = dma.hbm_to_vmem [thread:$0]  (!%p1795_p5), %s2055_s1, 3072, %s1791_s15, [#allocation3], %s1719_s25, %s1719_s25, %s1720_s26  }
  0x23   : > { %s1683_s29 = scalar_lea.vmem %s288_s18, 6144  ;;  %p1691_p0 = scmp.lt.s32.totalorder %s288_s18, %s288_s18 }
  0x24   : > { %p1684_p11 = scmp.ne.s32.totalorder %s288_s18, %s1683_s29  ;;  %p1692_p1 = scmp.lt.s32.totalorder %s1683_s29, %s1683_s29 }
  0x26   : > { %p1686_p12 = pnand %p1684_p11, %p1622_p6  ;;  %p1693_p4 = por %p1692_p1, %p1691_p0 }
  0x28   : > { %p1687_p13 = pneg %p1686_p12 }
  0x2a   : > { %p1694_p7 = pnand %p1693_p4, %p1687_p13 }
  0x2c   : > { %1697 = shalt.err (!%p1694_p7)
}
  0x2d   : > { %1579 = dma.hbm_to_vmem [thread:$0]  (!%p1795_p5), %s2058_s4, 6144, %s288_s18, [#allocation5], %s1719_s25, %s1719_s25, %s1720_s26  }
  0x2e   : > { %322 = sbr.rel (%p1785_p3) target bundleno = 1236 (0x4d4), region = 56 }
  0x33   : > { %1703 = dma.done.wait (%p1580_p2), [#allocation3], 3072  }
  0x34   : > { %1705 = vsyncadd (%p1580_p2), [#allocation3], 4294964224 }
  0x35   : > { %1707 = dma.done.wait (%p1580_p2), [#allocation5], 6400  }
  0x36   : > { %1709 = vsyncadd (%p1580_p2), [#allocation5], 4294960896  ;;  %v1721_v0 = vmov 0.0   ;;  %vm1722_vm0 = vmmov 0   ;;  %p365_p3 = scmp.lt.s32.totalorder %s1780_s12, 1  ;;  %v398_v1 = vld [vmem:[#allocation2 + $0xb0] sm:$0xff] }
  0x37   : > { %1439 = vmatprep.subr.mxu1 %v1721_v0  ;;  %1455 = vmatprep.mubr.msk.f32.mxu1 %vm1722_vm0, %v1721_v0  ;;  %v399_v2 = vld [vmem:[#allocation2 + $0xb8] sm:$0xff]  ;;  %v397_v3 = vld [vmem:[#allocation2 + $0xa8] sm:$0xff]  ;;  %v396_v5 = vld [vmem:[#allocation2 + $0xa0] sm:$0xff]  ;;  %vm400_vm1 = vcmask 523264   ;;  %vm548_vm2 = vcmask 195584   ;;  %vm845_vm3 = vcmask 392192  }
  0x38   : > { %468 = vmatprep.mubr.f32.mxu0 %v1721_v0  ;;  %420 = vmatprep.subr.mxu0 %v398_v1  ;;  %v395_v4 = vld [vmem:[#allocation2 + $0x98] sm:$0xff]  ;;  %v394_v6 = vld [vmem:[#allocation2 + $0x90] sm:$0xff]  ;;  %v392_v7 = vld [vmem:[#allocation2 + $0x80] sm:$0xff]  ;;  %s366_s13 = scalar_select %p365_p3, %s1780_s12, 1  ;;  %vm1183_vm4 = vcmask 1046528  }
  0x39   : > { %1440 = vmatpush3.msra.mxu1 %v399_v2  ;;  %421 = vmatpush1.msra.mxu0 %v397_v3  ;;  %v393_v8 = vld [vmem:[#allocation2 + $0x88] sm:$0xff]  ;;  %v391_v9 = vld [vmem:[#allocation2 + $0x78] sm:$0xff]  ;;  %v390_v11 = vld [vmem:[#allocation2 + $0x70] sm:$0xff]  ;;  %s1723_s11 = smov 64   ;;  %s1358_s15 = sshll.u32 %s1780_s12, 2 }
  0x3a   : > { %1441 = vmatprep.subr.mxu1 %v1721_v0  ;;  %422 = vmatprep.subr.mxu0 %v395_v4  ;;  %v389_v10 = vld [vmem:[#allocation2 + $0x68] sm:$0xff]  ;;  %v388_v12 = vld [vmem:[#allocation2 + $0x60] sm:$0xff]  ;;  %v386_v13 = vld [vmem:[#allocation2 + $0x50] sm:$0xff]  ;;  %s1357_s14 = sshll.u32 %s366_s13, 3  ;;  %p370_p2 = scmp.lt.s32.totalorder %s1358_s15, 7 }
  0x3b   : > { %1442 = vmatpush3.msra.mxu1 %v396_v5  ;;  %423 = vmatpush1.msra.mxu0 %v394_v6  ;;  %v387_v14 = vld [vmem:[#allocation2 + $0x58] sm:$0xff]  ;;  %v385_v15 = vld [vmem:[#allocation2 + $0x48] sm:$0xff]  ;;  %v384_v17 = vld [vmem:[#allocation2 + $0x40] sm:$0xff]  ;;  %s368_s17 = scalar_lea.vmem %s2054_s0, %s1357_s14 }
  0x3c   : > { %1443 = vmatprep.subr.mxu1 %v1721_v0  ;;  %424 = vmatprep.subr.mxu0 %v392_v7  ;;  %v383_v16 = vld [vmem:[#allocation2 + $0x38] sm:$0xff]  ;;  %v382_v18 = vld [vmem:[#allocation2 + $0x30] sm:$0xff]  ;;  %v380_v19 = vld [vmem:[#allocation2 + $0x20] sm:$0xff]  ;;  %s2067_s15 = smov (!%p370_p2, %s1358_s15), 7 }
  0x3d   : > { %1444 = vmatpush3.msra.mxu1 %v393_v8  ;;  %425 = vmatpush1.msra.mxu0 %v391_v9  ;;  %v381_v20 = vld [vmem:[#allocation2 + $0x28] sm:$0xff]  ;;  %v379_v21 = vld [vmem:[#allocation2 + $0x18] sm:$0xff]  ;;  %v378_v23 = vld [vmem:[#allocation2 + $0x10] sm:$0xff]  ;;  %s1359_s16 = sshll.u32 %s2067_s15, 3 }
  0x3e   : > { %1445 = vmatprep.subr.mxu1 %v1721_v0  ;;  %426 = vmatprep.subr.mxu0 %v389_v10  ;;  %v377_v22 = vld [vmem:[#allocation2 + $0x8] sm:$0xff]  ;;  %v376_v24 = vld [vmem:[#allocation2] sm:$0xff]  ;;  %v685_v28 = vld [vmem:[#allocation6 + $0x168] sm:$0xff]  ;;  %s373_s19 = scalar_lea.vmem %s2063_s9, %s1359_s16 }
  0x3f   : > { %1446 = vmatpush3.msra.mxu1 %v390_v11  ;;  %427 = vmatpush1.msra.mxu0 %v388_v12  ;;  %v375_v25 = vld [vmem:[%s368_s17] sm:$0xff]  ;;  %v683_v29 = vld [vmem:[#allocation6 + $0x158] sm:$0xff]  ;;  %v680_v31 = vld [vmem:[#allocation6 + $0x140] sm:$0xff] }
  0x40   : > { %1447 = vmatprep.subr.mxu1 %v1721_v0  ;;  %428 = vmatprep.subr.mxu0 %v386_v13  ;;  %v546_v26 = vld [vmem:[#allocation4] sm:$0xff]  ;;  %v679_v32 = vld [vmem:[#allocation6 + $0x138] sm:$0xff]  ;;  %v677_v33 = vld [vmem:[#allocation6 + $0x128] sm:$0xff] }
  0x41   : > { %1448 = vmatpush3.msra.mxu1 %v387_v14  ;;  %429 = vmatpush1.msra.mxu0 %v385_v15  ;;  %v686_v27 = vld [vmem:[#allocation6 + $0x170] sm:$0xff]  ;;  %v676_v34 = vld [vmem:[#allocation6 + $0x120] sm:$0xff]  ;;  %v673_v36 = vld [vmem:[#allocation6 + $0x108] sm:$0xff] }
  0x42   : > { %1449 = vmatprep.subr.mxu1 %v1721_v0  ;;  %430 = vmatprep.subr.mxu0 %v383_v16  ;;  %v682_v30 = vld [vmem:[#allocation6 + $0x150] sm:$0xff]  ;;  %v671_v37 = vld [vmem:[#allocation6 + $0xf8] sm:$0xff]  ;;  %v668_v39 = vld [vmem:[#allocation6 + $0xe0] sm:$0xff] }
  0x43   : > { %1450 = vmatpush3.msra.mxu1 %v384_v17  ;;  %431 = vmatpush1.msra.mxu0 %v382_v18  ;;  %v674_v35 = vld [vmem:[#allocation6 + $0x110] sm:$0xff]  ;;  %v667_v40 = vld [vmem:[#allocation6 + $0xd8] sm:$0xff]  ;;  %v665_v41 = vld [vmem:[#allocation6 + $0xc8] sm:$0xff] }
  0x44   : > { %1451 = vmatprep.subr.mxu1 %v1721_v0  ;;  %432 = vmatprep.subr.mxu0 %v380_v19  ;;  %v670_v38 = vld [vmem:[#allocation6 + $0xf0] sm:$0xff]  ;;  %v664_v42 = vld [vmem:[#allocation6 + $0xc0] sm:$0xff]  ;;  %v661_v44 = vld [vmem:[#allocation6 + $0xa8] sm:$0xff] }
  0x45   : > { %1452 = vmatpush3.msra.mxu1 %v381_v20  ;;  %433 = vmatpush1.msra.mxu0 %v379_v21  ;;  %v662_v43 = vld [vmem:[#allocation6 + $0xb0] sm:$0xff]  ;;  %v659_v45 = vld [vmem:[#allocation6 + $0x98] sm:$0xff]  ;;  %v656_v47 = vld [vmem:[#allocation6 + $0x80] sm:$0xff] }
  0x46   : > { %1453 = vmatprep.subr.mxu1 %v1721_v0  ;;  %434 = vmatprep.subr.mxu0 %v377_v22  ;;  %v658_v46 = vld [vmem:[#allocation6 + $0x90] sm:$0xff]  ;;  %v655_v48 = vld [vmem:[#allocation6 + $0x78] sm:$0xff]  ;;  %v653_v49 = vld [vmem:[#allocation6 + $0x68] sm:$0xff] }
  0x47   : > { %1454 = vmatpush3.msra.mxu1 %v378_v23  ;;  %435 = vmatpush1.msra.mxu0 %v376_v24  ;;  %v652_v50 = vld [vmem:[#allocation6 + $0x60] sm:$0xff]  ;;  %v650_v51 = vld [vmem:[#allocation6 + $0x50] sm:$0xff]  ;;  %v547_v56 = vld [vmem:[#allocation4 + $0x8] sm:$0xff] }
  0x48   : > { %1456 = vmatmul.mubr.msk.f32.vlgmr.msra.gmra.mxu1 %vm400_vm1, %v375_v25  ;;  %1360 = vmatmul.mubr.msk.f32.vlgmr.msra.gmra.mxu0 %vm400_vm1, %v375_v25  ;;  %v687_v57 = vld [vmem:[#allocation6 + $0x178] sm:$0xff]  ;;  %v684_v58 = vld [vmem:[#allocation6 + $0x160] sm:$0xff]  ;;  %v681_v59 = vld [vmem:[#allocation6 + $0x148] sm:$0xff] }
  0x49   : > { %752 = vmatprep.mubr.f32.mxu1 %v1721_v0  ;;  %1464 = vmatprep.mubr.msk.f32.mxu0 %vm548_vm2, %v546_v26  ;;  %v678_v60 = vld [vmem:[#allocation6 + $0x130] sm:$0xff]  ;;  %v675_v61 = vld [vmem:[#allocation6 + $0x118] sm:$0xff]  ;;  %v672_v62 = vld [vmem:[#allocation6 + $0x100] sm:$0xff] }
  0x4a   : > { %688 = vmatprep.subr.mxu1 %v686_v27  ;;  %v669_v63 = vld [vmem:[#allocation6 + $0xe8] sm:$0xff]  ;;  %v666_v1 = vld [vmem:[#allocation6 + $0xd0] sm:$0xff]  ;;  %v663_v2 = vld [vmem:[#allocation6 + $0xb8] sm:$0xff] }
  0x4b   : > { %689 = vmatpush1.msra.mxu1 %v685_v28  ;;  %v660_v3 = vld [vmem:[#allocation6 + $0xa0] sm:$0xff]  ;;  %v657_v4 = vld [vmem:[#allocation6 + $0x88] sm:$0xff]  ;;  %v654_v5 = vld [vmem:[#allocation6 + $0x70] sm:$0xff] }
  0x4c   : > { %690 = vmatprep.subr.mxu1 %v683_v29  ;;  %v649_v6 = vld [vmem:[#allocation6 + $0x48] sm:$0xff]  ;;  %v651_v7 = vld [vmem:[#allocation6 + $0x58] sm:$0xff]  ;;  %v646_v9 = vld [vmem:[#allocation6 + $0x30] sm:$0xff] }
  0x4d   : > { %691 = vmatpush1.msra.mxu1 %v682_v30  ;;  %v647_v8 = vld [vmem:[#allocation6 + $0x38] sm:$0xff]  ;;  %v648_v10 = vld [vmem:[#allocation6 + $0x40] sm:$0xff]  ;;  %v645_v13 = vld [vmem:[#allocation6 + $0x28] sm:$0xff] }
  0x4e   : > { %692 = vmatprep.subr.mxu1 %v680_v31  ;;  %v644_v11 = vld [vmem:[#allocation6 + $0x20] sm:$0xff]  ;;  %v643_v12 = vld [vmem:[#allocation6 + $0x18] sm:$0xff]  ;;  %v641_v14 = vld [vmem:[#allocation6 + $0x8] sm:$0xff] }
  0x4f   : > { %693 = vmatpush1.msra.mxu1 %v679_v32  ;;  %v640_v15 = vld [vmem:[#allocation6] sm:$0xff]  ;;  %v642_v16 = vld [vmem:[#allocation6 + $0x10] sm:$0xff]  ;;  %v1002_v26 = vld [vmem:[%s2061_s7 + $0x168] sm:$0xff] }
  0x50   : > { %694 = vmatprep.subr.mxu1 %v677_v33  ;;  %v1364_v17 = vld [vmem:[%s2057_s3] ss:$0 sm:$0xff]  ;;  %v1003_v25 = vld [vmem:[%s2061_s7 + $0x170] sm:$0xff]  ;;  %v1000_v27 = vld [vmem:[%s2061_s7 + $0x158] sm:$0xff] }
  0x51   : > { %695 = vmatpush1.msra.mxu1 %v676_v34  ;;  %v841_v24 = vld [vmem:[%s2059_s5] sm:$0xff]  ;;  %v999_v28 = vld [vmem:[%s2061_s7 + $0x150] sm:$0xff]  ;;  %v996_v30 = vld [vmem:[%s2061_s7 + $0x138] sm:$0xff] }
  0x52   : > { %696 = vmatprep.subr.mxu1 %v674_v35  ;;  %v997_v29 = vld [vmem:[%s2061_s7 + $0x140] sm:$0xff]  ;;  %v994_v31 = vld [vmem:[%s2061_s7 + $0x128] sm:$0xff]  ;;  %v991_v33 = vld [vmem:[%s2061_s7 + $0x110] sm:$0xff] }
  0x53   : > { %697 = vmatpush1.msra.mxu1 %v673_v36  ;;  %v993_v32 = vld [vmem:[%s2061_s7 + $0x120] sm:$0xff]  ;;  %v990_v34 = vld [vmem:[%s2061_s7 + $0x108] sm:$0xff]  ;;  %v988_v35 = vld [vmem:[%s2061_s7 + $0xf8] sm:$0xff] }
  0x54   : > { %698 = vmatprep.subr.mxu1 %v671_v37  ;;  %v987_v36 = vld [vmem:[%s2061_s7 + $0xf0] sm:$0xff]  ;;  %v985_v37 = vld [vmem:[%s2061_s7 + $0xe0] sm:$0xff] }
  0x55   : > { %699 = vmatpush1.msra.mxu1 %v670_v38  ;;  %v984_v38 = vld [vmem:[%s2061_s7 + $0xd8] sm:$0xff] }
  0x56   : > { %700 = vmatprep.subr.mxu1 %v668_v39  ;;  %v982_v39 = vld [vmem:[%s2061_s7 + $0xc8] sm:$0xff] }
  0x57   : > { %701 = vmatpush1.msra.mxu1 %v667_v40  ;;  %v981_v40 = vld [vmem:[%s2061_s7 + $0xc0] sm:$0xff] }
  0x58   : > { %702 = vmatprep.subr.mxu1 %v665_v41  ;;  %v979_v41 = vld [vmem:[%s2061_s7 + $0xb0] sm:$0xff] }
  0x59   : > { %703 = vmatpush1.msra.mxu1 %v664_v42  ;;  %v978_v42 = vld [vmem:[%s2061_s7 + $0xa8] sm:$0xff] }
  0x5a   : > { %704 = vmatprep.subr.mxu1 %v662_v43  ;;  %v976_v43 = vld [vmem:[%s2061_s7 + $0x98] sm:$0xff] }
  0x5b   : > { %705 = vmatpush1.msra.mxu1 %v661_v44  ;;  %v975_v44 = vld [vmem:[%s2061_s7 + $0x90] sm:$0xff] }
  0x5c   : > { %706 = vmatprep.subr.mxu1 %v659_v45  ;;  %v973_v45 = vld [vmem:[%s2061_s7 + $0x80] sm:$0xff] }
  0x5d   : > { %707 = vmatpush1.msra.mxu1 %v658_v46  ;;  %v972_v46 = vld [vmem:[%s2061_s7 + $0x78] sm:$0xff] }
  0x5e   : > { %708 = vmatprep.subr.mxu1 %v656_v47  ;;  %v970_v47 = vld [vmem:[%s2061_s7 + $0x68] sm:$0xff] }
  0x5f   : > { %709 = vmatpush1.msra.mxu1 %v655_v48  ;;  %v969_v48 = vld [vmem:[%s2061_s7 + $0x60] sm:$0xff] }
  0x60   : > { %710 = vmatprep.subr.mxu1 %v653_v49  ;;  %v967_v49 = vld [vmem:[%s2061_s7 + $0x50] sm:$0xff] }
  0x61   : > { %711 = vmatpush1.msra.mxu1 %v652_v50 }
  0x62   : > { %712 = vmatprep.subr.mxu1 %v650_v51 }
  0x63   : > { %713 = vmatpush1.msra.mxu1 %v649_v6  ;;  %v974_v6 = vld [vmem:[%s2061_s7 + $0x88] sm:$0xff] }
  0x64   : > { %714 = vmatprep.subr.mxu1 %v647_v8  ;;  %v966_v8 = vld [vmem:[%s2061_s7 + $0x48] sm:$0xff] }
  0x65   : > { %715 = vmatpush1.msra.mxu1 %v646_v9  ;;  %v968_v9 = vld [vmem:[%s2061_s7 + $0x58] sm:$0xff] }
  0x66   : > { %716 = vmatprep.subr.mxu1 %v644_v11  ;;  %v963_v11 = vld [vmem:[%s2061_s7 + $0x30] sm:$0xff] }
  0x67   : > { %717 = vmatpush1.msra.mxu1 %v643_v12  ;;  %v965_v12 = vld [vmem:[%s2061_s7 + $0x40] sm:$0xff] }
  0x68   : > { %718 = vmatprep.subr.mxu1 %v641_v14  ;;  %v960_v14 = vld [vmem:[%s2061_s7 + $0x18] sm:$0xff] }
  0x69   : > { %719 = vmatpush1.msra.mxu1 %v640_v15  ;;  %v962_v15 = vld [vmem:[%s2061_s7 + $0x28] sm:$0xff] }
 0x108   : > { %v541_v52 = vpop.f32.mrf.mxu1  ;;  %v470_v53 = vpop.f32.mrf.mxu0 }
 0x109   : > { %1458 = vmatprep.subr.mxu0 %v541_v52 }
 0x10a   : > { %v1457_v54 = vpop.f32.mrf.mxu1  ;;  %1459 = vmatpush3.msra.mxu0 %v541_v52  ;;  %v472_v55 = vpop.f32.mrf.mxu0 }
 0x10b   : > { %1460 = vmatprep.subr.mxu0 %v472_v55 }
 0x10c   : > { %1461 = vmatpush3.msra.mxu0 %v472_v55 }
 0x10d   : > { %1462 = vmatprep.subr.mxu0 %v470_v53 }
 0x10e   : > { %1463 = vmatpush3.msra.mxu0 %v470_v53 }
 0x10f   : > { %1465 = vmatmul.mubr.msk.f32.vlgmr.msra.gmra.mxu0 %vm548_vm2, %v547_v56  ;;  %1467 = vmatprep.subr.mxu0 %v687_v57  ;;  %v842_v56 = vld [vmem:[%s2059_s5 + $0x8] sm:$0xff] }
 0x110   : > { %1468 = vmatpush3.msra.mxu0 %v687_v57  ;;  %v1004_v57 = vld [vmem:[%s2061_s7 + $0x178] sm:$0xff] }
 0x111   : > { %1469 = vmatprep.subr.mxu0 %v684_v58 }
 0x112   : > { %1470 = vmatpush3.msra.mxu0 %v684_v58  ;;  %v843_v58 = vld [vmem:[%s2059_s5 + $0x10] sm:$0xff] }
 0x113   : > { %1471 = vmatprep.subr.mxu0 %v681_v59 }
 0x114   : > { %1472 = vmatpush3.msra.mxu0 %v681_v59  ;;  %v1001_v59 = vld [vmem:[%s2061_s7 + $0x160] sm:$0xff] }
 0x115   : > { %1473 = vmatprep.subr.mxu0 %v678_v60 }
 0x116   : > { %1474 = vmatpush3.msra.mxu0 %v678_v60  ;;  %v844_v60 = vld [vmem:[%s2059_s5 + $0x18] sm:$0xff] }
 0x117   : > { %1475 = vmatprep.subr.mxu0 %v675_v61 }
 0x118   : > { %1476 = vmatpush3.msra.mxu0 %v675_v61  ;;  %v998_v61 = vld [vmem:[%s2061_s7 + $0x148] sm:$0xff] }
 0x119   : > { %1477 = vmatprep.subr.mxu0 %v672_v62 }
 0x11a   : > { %1478 = vmatpush3.msra.mxu0 %v672_v62  ;;  %v995_v62 = vld [vmem:[%s2061_s7 + $0x130] sm:$0xff] }
 0x11b   : > { %1479 = vmatprep.subr.mxu0 %v669_v63 }
 0x11c   : > { %1480 = vmatpush3.msra.mxu0 %v669_v63  ;;  %v992_v63 = vld [vmem:[%s2061_s7 + $0x118] sm:$0xff] }
 0x11d   : > { %1481 = vmatprep.subr.mxu0 %v666_v1 }
 0x11e   : > { %1482 = vmatpush3.msra.mxu0 %v666_v1  ;;  %v989_v1 = vld [vmem:[%s2061_s7 + $0x100] sm:$0xff] }
 0x11f   : > { %1483 = vmatprep.subr.mxu0 %v663_v2 }
 0x120   : > { %1484 = vmatpush3.msra.mxu0 %v663_v2  ;;  %v986_v2 = vld [vmem:[%s2061_s7 + $0xe8] sm:$0xff] }
 0x121   : > { %1485 = vmatprep.subr.mxu0 %v660_v3 }
 0x122   : > { %1486 = vmatpush3.msra.mxu0 %v660_v3  ;;  %v983_v3 = vld [vmem:[%s2061_s7 + $0xd0] sm:$0xff] }
 0x123   : > { %1487 = vmatprep.subr.mxu0 %v657_v4 }
 0x124   : > { %1488 = vmatpush3.msra.mxu0 %v657_v4  ;;  %v980_v4 = vld [vmem:[%s2061_s7 + $0xb8] sm:$0xff] }
 0x125   : > { %1489 = vmatprep.subr.mxu0 %v654_v5 }
 0x126   : > { %1490 = vmatpush3.msra.mxu0 %v654_v5  ;;  %v977_v5 = vld [vmem:[%s2061_s7 + $0xa0] sm:$0xff] }
 0x127   : > { %1491 = vmatprep.subr.mxu0 %v651_v7 }
 0x128   : > { %1492 = vmatpush3.msra.mxu0 %v651_v7  ;;  %v971_v7 = vld [vmem:[%s2061_s7 + $0x70] sm:$0xff] }
 0x129   : > { %1493 = vmatprep.subr.mxu0 %v648_v10 }
 0x12a   : > { %1494 = vmatpush3.msra.mxu0 %v648_v10  ;;  %v964_v10 = vld [vmem:[%s2061_s7 + $0x38] sm:$0xff] }
 0x12b   : > { %1495 = vmatprep.subr.mxu0 %v645_v13 }
 0x12c   : > { %1496 = vmatpush3.msra.mxu0 %v645_v13  ;;  %v961_v13 = vld [vmem:[%s2061_s7 + $0x20] sm:$0xff] }
 0x12d   : > { %1497 = vmatprep.subr.mxu0 %v642_v16 }
 0x12e   : > { %1498 = vmatpush3.msra.mxu0 %v642_v16  ;;  %v958_v16 = vld [vmem:[%s2061_s7 + $0x8] sm:$0xff] }
 0x12f   : > { %1005 = vmatprep.subr.mxu0 %v1003_v25 }
 0x1cf   : > { %v1466_v18 = vpop.f32.mrf.mxu0 }
 0x1d0   : > { %v637_v19 = vadd.f32 %v1466_v18, %v1364_v17  ;;  %v959_v18 = vld [vmem:[%s2061_s7 + $0x10] sm:$0xff] }
 0x1d1   : > { %v621_v20 = vpop.f32.mrf.mxu0 }
 0x1d2   : > { %v636_v21 = vadd.f32 %v1364_v17, %v621_v20  ;;  %v639_v23 = vmax.f32 %v637_v19, 0.0  ;;  %v957_v17 = vld [vmem:[%s2061_s7] sm:$0xff] }
 0x1d3   : > { %v1369_v19 = vld [vmem:[%s2060_s6] ss:$0 sm:$0xff] }
 0x1d4   : > { %v638_v22 = vmax.f32 %v636_v21, 0.0 }
 0x1d6   : > { %753 = vmatmul.mubr.f32.vlgmr.msra.gmra.mxu1 %v638_v22  ;;  %1499 = vmatprep.mubr.f32.mxu0 %v638_v22 }
 0x1d7   : > { %1500 = vmatmul.mubr.f32.vlgmr.msra.gmra.mxu0 %v639_v23  ;;  %758 = vmatprep.mubr.f32.mxu1 %v1721_v0 }
 0x1d8   : > { %1069 = vmatprep.mubr.f32.mxu0 %v1721_v0  ;;  %1006 = vmatpush1.msra.mxu0 %v1002_v26 }
 0x1d9   : > { %1007 = vmatprep.subr.mxu0 %v1000_v27 }
 0x1da   : > { %759 = vmatmul.mubr.f32.gmra.mxu1 %v639_v23  ;;  %1008 = vmatpush1.msra.mxu0 %v999_v28 }
 0x1db   : > { %1514 = vmatprep.mubr.msk.f32.mxu1 %vm845_vm3, %v841_v24  ;;  %1009 = vmatprep.subr.mxu0 %v997_v29 }
 0x1dc   : > { %1010 = vmatpush1.msra.mxu0 %v996_v30 }
 0x1dd   : > { %1011 = vmatprep.subr.mxu0 %v994_v31 }
 0x1de   : > { %1012 = vmatpush1.msra.mxu0 %v993_v32 }
 0x1df   : > { %1013 = vmatprep.subr.mxu0 %v991_v33 }
 0x1e0   : > { %1014 = vmatpush1.msra.mxu0 %v990_v34 }
 0x1e1   : > { %1015 = vmatprep.subr.mxu0 %v988_v35 }
 0x1e2   : > { %1016 = vmatpush1.msra.mxu0 %v987_v36 }
 0x1e3   : > { %1017 = vmatprep.subr.mxu0 %v985_v37 }
 0x1e4   : > { %1018 = vmatpush1.msra.mxu0 %v984_v38 }
 0x1e5   : > { %1019 = vmatprep.subr.mxu0 %v982_v39 }
 0x1e6   : > { %1020 = vmatpush1.msra.mxu0 %v981_v40 }
 0x1e7   : > { %1021 = vmatprep.subr.mxu0 %v979_v41 }
 0x1e8   : > { %1022 = vmatpush1.msra.mxu0 %v978_v42 }
 0x1e9   : > { %1023 = vmatprep.subr.mxu0 %v976_v43 }
 0x1ea   : > { %1024 = vmatpush1.msra.mxu0 %v975_v44 }
 0x1eb   : > { %1025 = vmatprep.subr.mxu0 %v973_v45 }
 0x1ec   : > { %1026 = vmatpush1.msra.mxu0 %v972_v46 }
 0x1ed   : > { %1027 = vmatprep.subr.mxu0 %v970_v47 }
 0x1ee   : > { %1028 = vmatpush1.msra.mxu0 %v969_v48 }
 0x1ef   : > { %1029 = vmatprep.subr.mxu0 %v967_v49 }
 0x1f0   : > { %1030 = vmatpush1.msra.mxu0 %v966_v8 }
 0x1f1   : > { %1031 = vmatprep.subr.mxu0 %v964_v10 }
 0x1f2   : > { %1032 = vmatpush1.msra.mxu0 %v963_v11 }
 0x1f3   : > { %1033 = vmatprep.subr.mxu0 %v961_v13 }
 0x1f4   : > { %1034 = vmatpush1.msra.mxu0 %v960_v14 }
 0x1f5   : > { %1035 = vmatprep.subr.mxu0 %v958_v16 }
 0x1f6   : > { %1036 = vmatpush1.msra.mxu0 %v957_v17 }
 0x296   : > { %v754_v50 = vpop.f32.mrf.mxu1 }
 0x297   : > { %v1501_v51 = vpop.f32.mrf.mxu0 }
 0x298   : > { %v756_v52 = vpop.f32.mrf.mxu1  ;;  %1502 = vmatprep.subr.mxu1 %v1501_v51 }
 0x299   : > { %v831_v53 = vpop.f32.mrf.mxu0  ;;  %1503 = vmatpush3.msra.mxu1 %v1501_v51 }
 0x29a   : > { %v760_v54 = vpop.f32.mrf.mxu1  ;;  %1504 = vmatprep.subr.mxu1 %v831_v53 }
 0x29b   : > { %1505 = vmatpush3.msra.mxu1 %v831_v53 }
 0x29c   : > { %v762_v55 = vpop.f32.mrf.mxu1 }
 0x29d   : > { %1506 = vmatprep.subr.mxu1 %v762_v55 }
 0x29e   : > { %1507 = vmatpush3.msra.mxu1 %v762_v55 }
 0x29f   : > { %1508 = vmatprep.subr.mxu1 %v756_v52 }
 0x2a0   : > { %1509 = vmatpush3.msra.mxu1 %v756_v52 }
 0x2a1   : > { %1510 = vmatprep.subr.mxu1 %v760_v54 }
 0x2a2   : > { %1511 = vmatpush3.msra.mxu1 %v760_v54  ;;  %v1370_v54 = vld [vmem:[%s2062_s8] ss:$0 sm:$0xff] }
 0x2a3   : > { %1512 = vmatprep.subr.mxu1 %v754_v50 }
 0x2a4   : > { %1513 = vmatpush3.msra.mxu1 %v754_v50 }
 0x2a5   : > { %1515 = vmatmul.mubr.msk.f32.vlgmr.msra.gmra.mxu1 %vm845_vm3, %v842_v56  ;;  %1520 = vmatprep.subr.mxu1 %v1004_v57 }
 0x2a6   : > { %1517 = vmatprep.mubr.msk.f32.mxu1 %vm845_vm3, %v843_v58  ;;  %1521 = vmatpush3.msra.mxu1 %v1004_v57 }
 0x2a7   : > { %1522 = vmatprep.subr.mxu1 %v1001_v59 }
 0x2a8   : > { %1523 = vmatpush3.msra.mxu1 %v1001_v59 }
 0x2a9   : > { %1518 = vmatmul.mubr.msk.f32.gmra.mxu1 %vm845_vm3, %v844_v60  ;;  %1524 = vmatprep.subr.mxu1 %v998_v61 }
 0x2aa   : > { %1525 = vmatpush3.msra.mxu1 %v998_v61 }
 0x2ab   : > { %1526 = vmatprep.subr.mxu1 %v995_v62 }
 0x2ac   : > { %1527 = vmatpush3.msra.mxu1 %v995_v62 }
 0x2ad   : > { %1528 = vmatprep.subr.mxu1 %v992_v63 }
 0x2ae   : > { %1529 = vmatpush3.msra.mxu1 %v992_v63 }
 0x2af   : > { %1530 = vmatprep.subr.mxu1 %v989_v1 }
 0x2b0   : > { %1531 = vmatpush3.msra.mxu1 %v989_v1 }
 0x2b1   : > { %1532 = vmatprep.subr.mxu1 %v986_v2 }
 0x2b2   : > { %1533 = vmatpush3.msra.mxu1 %v986_v2 }
 0x2b3   : > { %1534 = vmatprep.subr.mxu1 %v983_v3 }
 0x2b4   : > { %1535 = vmatpush3.msra.mxu1 %v983_v3 }
 0x2b5   : > { %1536 = vmatprep.subr.mxu1 %v980_v4 }
 0x2b6   : > { %1537 = vmatpush3.msra.mxu1 %v980_v4 }
 0x2b7   : > { %1538 = vmatprep.subr.mxu1 %v977_v5 }
 0x2b8   : > { %1539 = vmatpush3.msra.mxu1 %v977_v5 }
 0x2b9   : > { %1540 = vmatprep.subr.mxu1 %v974_v6 }
 0x2ba   : > { %1541 = vmatpush3.msra.mxu1 %v974_v6 }
 0x2bb   : > { %1542 = vmatprep.subr.mxu1 %v971_v7 }
 0x2bc   : > { %1543 = vmatpush3.msra.mxu1 %v971_v7 }
 0x2bd   : > { %1544 = vmatprep.subr.mxu1 %v968_v9 }
 0x2be   : > { %1545 = vmatpush3.msra.mxu1 %v968_v9 }
 0x2bf   : > { %1546 = vmatprep.subr.mxu1 %v965_v12 }
 0x2c0   : > { %1547 = vmatpush3.msra.mxu1 %v965_v12 }
 0x2c1   : > { %1548 = vmatprep.subr.mxu1 %v962_v15 }
 0x2c2   : > { %1549 = vmatpush3.msra.mxu1 %v962_v15 }
 0x2c3   : > { %1550 = vmatprep.subr.mxu1 %v959_v18 }
 0x2c4   : > { %1551 = vmatpush3.msra.mxu1 %v959_v18 }
 0x365   : > { %v1516_v20 = vpop.f32.mrf.mxu1 }
 0x366   : > { %v950_v21 = vadd.f32 %v1516_v20, %v1369_v19 }
 0x367   : > { %v924_v22 = vpop.f32.mrf.mxu1 }
 0x368   : > { %v949_v23 = vadd.f32 %v1369_v19, %v924_v22  ;;  %v954_v26 = vmax.f32 %v950_v21, 0.0 }
 0x369   : > { %v1519_v24 = vpop.f32.mrf.mxu1 }
 0x36a   : > { %v953_v25 = vmax.f32 %v949_v23, 0.0  ;;  %v952_v27 = vadd.f32 %v1519_v24, %v1369_v19 }
 0x36b   : > { %v934_v28 = vpop.f32.mrf.mxu1 }
 0x36c   : > { %v951_v29 = vadd.f32 %v1369_v19, %v934_v28  ;;  %1070 = vmatmul.mubr.f32.vlgmr.msra.gmra.mxu0 %v953_v25  ;;  %1552 = vmatprep.mubr.f32.mxu1 %v953_v25  ;;  %v956_v31 = vmax.f32 %v952_v27, 0.0 }
 0x36d   : > { %1553 = vmatmul.mubr.f32.vlgmr.msra.gmra.mxu1 %v954_v26  ;;  %1075 = vmatprep.mubr.f32.mxu0 %v1721_v0 }
 0x36e   : > { %v955_v30 = vmax.f32 %v951_v29, 0.0 }
 0x370   : > { %1076 = vmatmul.mubr.f32.gmra.mxu0 %v954_v26  ;;  %1555 = vmatprep.mubr.f32.mxu1 %v955_v30 }
 0x371   : > { %1556 = vmatmul.mubr.f32.gmra.mxu1 %v956_v31  ;;  %1081 = vmatprep.mubr.f32.mxu0 %v1721_v0 }
 0x374   : > { %1082 = vmatmul.mubr.f32.gmra.mxu0 %v955_v30 }
 0x375   : > { %1087 = vmatprep.mubr.f32.mxu0 %v1721_v0 }
 0x378   : > { %1088 = vmatmul.mubr.f32.gmra.mxu0 %v956_v31 }
 0x42c   : > { %v1071_v32 = vpop.f32.mrf.mxu0 }
 0x42d   : > { %v1554_v33 = vpop.f32.mrf.mxu1 }
 0x42e   : > { %v1073_v34 = vpop.f32.mrf.mxu0  ;;  %v1185_v36 = vrot.slane %v1554_v33, 1 }
 0x42f   : > { %v1160_v35 = vpop.f32.mrf.mxu1 }
 0x430   : > { %v1184_v37 = vrot.slane %v1160_v35, 1  ;;  %v1077_v38 = vpop.f32.mrf.mxu0 }
 0x431   : > { %v1557_v39 = vpop.f32.mrf.mxu1 }
 0x432   : > { %v1079_v40 = vpop.f32.mrf.mxu0  ;;  %v1186_v41 = vsel %vm1183_vm4, %v1184_v37, %v1185_v36  ;;  %v1189_v44 = vrot.slane %v1557_v39, 1 }
 0x433   : > { %v1170_v42 = vpop.f32.mrf.mxu1  ;;  %v1196_v43 = vadd.f32 %v1186_v41, %v1071_v32 }
 0x434   : > { %v1187_v45 = vrot.slane %v1170_v42, 1  ;;  %v1083_v46 = vpop.f32.mrf.mxu0  ;;  %v1195_v52 = vsel %vm1183_vm4, %v1189_v44, 0.0 }
 0x435   : > { %1204 = vrot.lane.b32.xlu0 %v1196_v43, %s1723_s11 }
 0x436   : > { %v1188_v0 = vsel %vm1183_vm4, %v1185_v36, %v1187_v45  ;;  %v1190_v47 = vsel %vm1183_vm4, %v1187_v45, %v1189_v44  ;;  %v1085_v48 = vpop.f32.mrf.mxu0 }
 0x437   : > { %v1198_v49 = vadd.f32 %v1190_v47, %v1083_v46  ;;  %v1197_v50 = vadd.f32 %v1188_v0, %v1077_v38 }
 0x438   : > { %v1089_v51 = vpop.f32.mrf.mxu0 }
 0x439   : > { %1206 = vrot.lane.b32.xlu0 %v1197_v50, %s1723_s11  ;;  %1208 = vrot.lane.b32.xlu1 %v1198_v49, %s1723_s11  ;;  %v1199_v53 = vadd.f32 %v1195_v52, %v1089_v51 }
 0x43a   : > { %v1091_v2 = vpop.f32.mrf.mxu0 }
 0x43d   : > { %1210 = vrot.lane.b32.xlu1 %v1199_v53, %s1723_s11 }
 0x4a7   : > { %v1205_v55 = vpop.permute.xlu0 %1204 }
 0x4a8   : > { %v1216_v56 = vsel %vm400_vm1, %v1073_v34, %v1205_v55 }
 0x4a9   : > { %v1227_v57 = vadd.f32 %v1370_v54, %v1216_v56 }
 0x4ab   : > { %v1371_v58 = vmul.f32 -1.442695, %v1227_v57  ;;  %v1207_v59 = vpop.permute.xlu0 %1206  ;;  %v1209_v60 = vpop.permute.xlu1 %1208 }
 0x4ac   : > { %v1217_v61 = vsel %vm400_vm1, %v1079_v40, %v1207_v59  ;;  %v1218_v62 = vsel %vm400_vm1, %v1085_v48, %v1209_v60 }
 0x4ad   : > { %1604 = vpow2.f32 %v1371_v58  ;;  %v1228_v63 = vadd.f32 %v1370_v54, %v1217_v61  ;;  %v1229_v1 = vadd.f32 %v1370_v54, %v1218_v62 }
 0x4af   : > { %v1372_v3 = vmul.f32 -1.442695, %v1228_v63  ;;  %v1373_v4 = vmul.f32 -1.442695, %v1229_v1  ;;  %v1211_v5 = vpop.permute.xlu1 %1210 }
 0x4b0   : > { %v1219_v6 = vsel %vm400_vm1, %v1091_v2, %v1211_v5 }
 0x4b1   : > { %1606 = vpow2.f32 %v1372_v3  ;;  %v1230_v7 = vadd.f32 %v1370_v54, %v1219_v6 }
 0x4b2   : > { %1608 = vpow2.f32 %v1373_v4 }
 0x4b3   : > { %v1374_v8 = vmul.f32 -1.442695, %v1230_v7 }
 0x4b5   : > { %1610 = vpow2.f32 %v1374_v8 }
 0x4ba   : > { %v1605_v9 = vpop.eup %1604 }
 0x4bb   : > { %v1243_v10 = vadd.f32 1.0, %v1605_v9 }
 0x4bd   : > { %1612 = vrcp.f32 %v1243_v10 }
 0x4be   : > { %v1607_v11 = vpop.eup %1606 }
 0x4bf   : > { %v1609_v12 = vpop.eup %1608  ;;  %v1244_v13 = vadd.f32 1.0, %v1607_v11 }
 0x4c0   : > { %v1245_v14 = vadd.f32 1.0, %v1609_v12 }
 0x4c1   : > { %1614 = vrcp.f32 %v1244_v13 }
 0x4c2   : > { %v1611_v15 = vpop.eup %1610  ;;  %1616 = vrcp.f32 %v1245_v14 }
 0x4c3   : > { %v1246_v16 = vadd.f32 1.0, %v1611_v15 }
 0x4c5   : > { %1618 = vrcp.f32 %v1246_v16 }
 0x4ca   : > { %v1613_v17 = vpop.eup %1612 }
 0x4cb   : > { %1255 = vst [vmem:[%s373_s19] sm:$0xff] %v1613_v17 }
 0x4ce   : > { %v1615_v18 = vpop.eup %1614 }
 0x4cf   : > { %v1617_v19 = vpop.eup %1616  ;;  %1256 = vst [vmem:[%s373_s19 + $0x8] sm:$0xff] %v1615_v18 }
 0x4d0   : > { %1257 = vst [vmem:[%s373_s19 + $0x10] sm:$0xff] %v1617_v19 }
 0x4d2   : > { %v1619_v20 = vpop.eup %1618 }
 0x4d3   : > { %1258 = vst [vmem:[%s373_s19 + $0x18] sm:$0xff] %v1619_v20 }
 0x4d4 PF: > { %s21_s30 = sadd.s32 1, %s1712_s30  }
 0x4d5   : > { %p18_p5 = scmp.ge.s32.totalorder %s21_s30, 4  }
 0x4d7   :  { %20 = sbr.rel (!%p18_p5) target bundleno = 2 (0x2), region = 99 }
 0x4dc   :  { %1281 = vsyncpa [#allocation3], 1 }
 0x4dd   :  { %1283 = vsyncpa [#allocation3 + $0x1], 1 }
 0x4de   :  { %1284 = vsyncpa [#allocation5], 1 }

</bundles_post_ra>
